<compile_context>
chip_gen: v7x
topology: tpu7x:2x2x1
jax: 0.10.0
libtpu: 0.0.40
codegen_flags: <defaults>
</compile_context>

<pallas_src>
import functools
import math

import jax
import jax.numpy as jnp
from jax import lax
from jax.experimental import pallas as pl
from jax.experimental.pallas import tpu as pltpu


# ----------------------------- kernel ----------------------------------------

def _fused_mha_kernel(xq_ref, xkv_ref, wq_ref, wk_ref, wv_ref,
                      bq_ref, bk_ref, bv_ref, wc_ref, bc_ref,
                      o_ref, k_scr, v_scr, z_scr,
                      *, nr_heads, hidden_dim, seq_len, cdt, approx_recip):
    """Grid point = (batch b, query tile qi)."""
    qi = pl.program_id(1)
    s_pad = k_scr.shape[0]

    # --- K/V projections: once per batch, resident in VMEM scratch ------------
    @pl.when(qi == 0)
    def _():
        xkv = xkv_ref[0]                                              # (S_pad, D)
        k_all = jnp.dot(xkv, wk_ref[...],
                        preferred_element_type=jnp.float32) + bk_ref[...]
        v_all = jnp.dot(xkv, wv_ref[...],
                        preferred_element_type=jnp.float32) + bv_ref[...]
        k_scr[...] = k_all.astype(k_scr.dtype)
        v_scr[...] = v_all.astype(v_scr.dtype)

    # --- Q projection for this query tile (scale folded into W_Q / b_Q) -------
    xq = xq_ref[0]                                                    # (TQ, D)
    q_all = jnp.dot(xq, wq_ref[...],
                    preferred_element_type=jnp.float32) + bq_ref[...]
    q_all = q_all.astype(cdt)                                         # MXU-native operands

    need_mask = seq_len < s_pad
    if need_mask:  # static: only when S was padded up to a tile multiple
        key_valid = lax.broadcasted_iota(jnp.int32, (1, s_pad), 1) < seq_len

    # --- Per-head attention, results written into the z scratch slab ----------
    for h in range(nr_heads):
        lo = h * hidden_dim
        hi = lo + hidden_dim
        q = q_all[:, lo:hi]                                           # (TQ, hd) cdt
        k = k_scr[:, lo:hi]                                           # (S_pad, hd) cdt
        # Contract on the last axes directly -- no k.T relayout.
        s = lax.dot_general(q, k, (((1,), (1,)), ((), ())),
                            preferred_element_type=jnp.float32)       # (TQ, S_pad) f32
        if need_mask:
            s = jnp.where(key_valid, s, -jnp.inf)
        s = s - jnp.max(s, axis=-1, keepdims=True)                    # stable softmax (f32)
        p = jnp.exp(s)
        p = p * pl.reciprocal(jnp.sum(p, axis=-1, keepdims=True),
                              approx=approx_recip)
        pv = jnp.dot(p.astype(cdt), v_scr[:, lo:hi],
                     preferred_element_type=jnp.float32)              # (TQ, hd) f32
        z_scr[:, lo:hi] = pv.astype(z_scr.dtype)

    # --- Fused output projection (lane-dense D_pad columns) -------------------
    out = jnp.dot(z_scr[...], wc_ref[...],
                  preferred_element_type=jnp.float32) + bc_ref[...]
    o_ref[0] = out.astype(o_ref.dtype)


# ----------------------------- wrapper ----------------------------------------

def multi_head_attention(x, params, compute_dtype=jnp.bfloat16, q_tile=256):
    """x: (B, S, D). params mirror the PyTorch module (weights (in, out); y = x@W + b).

    compute_dtype=bf16 is the performance path (MXU-native operands); pass
    jnp.float32 for bit-accurate validation against the f32 reference.
    """
    wq, wk, wv, bq, bk, bv, wc, bc = params
    B, S, D = x.shape
    H, _, hd = wq.shape
    Hhd = H * hd
    cdt = jnp.dtype(compute_dtype)
    approx_recip = (cdt != jnp.dtype(jnp.float32))

    scale = 1.0 / math.sqrt(hd)

    # ---- query tiling -----------------------------------------------------
    if S <= q_tile:
        TQ, S_pad = S, S
    else:
        TQ = q_tile                                   # multiple of 8 (256)
        S_pad = ((S + TQ - 1) // TQ) * TQ
    NQ = S_pad // TQ

    # ---- lane-dense output: pad D up to a multiple of 128 ------------------
    LANE = 128
    D_pad = ((D + LANE - 1) // LANE) * LANE

    # ---- repack per-head weights (H, D, hd) -> (D, H*hd), head-major --------
    # Column block h*hd:(h+1)*hd is head h (matches torch.cat(scores, dim=-1)).
    # Fold the 1/sqrt(hd) attention scale into W_Q / b_Q.
    def flat(w):
        return jnp.transpose(w, (1, 0, 2)).reshape(D, Hhd)

    wq_f = (flat(wq) * scale).astype(cdt)
    wk_f = flat(wk).astype(cdt)
    wv_f = flat(wv).astype(cdt)
    bq_f = (bq.reshape(1, Hhd) * scale).astype(jnp.float32)
    bk_f = bk.reshape(1, Hhd).astype(jnp.float32)
    bv_f = bv.reshape(1, Hhd).astype(jnp.float32)
    # Zero-padded W_concat columns / bias -> lane-dense (D_pad) output stores.
    wc_f = jnp.zeros((Hhd, D_pad), cdt).at[:, :D].set(wc.astype(cdt))
    bc_f = jnp.zeros((1, D_pad), jnp.float32).at[:, :D].set(bc.astype(jnp.float32))

    x_c = x.astype(cdt)
    if S_pad != S:
        x_c = jnp.pad(x_c, ((0, 0), (0, S_pad - S), (0, 0)))

    kernel = functools.partial(_fused_mha_kernel, nr_heads=H, hidden_dim=hd,
                               seq_len=S, cdt=cdt, approx_recip=approx_recip)

    # ---- VMEM budget + cost estimate ----------------------------------------
    cbytes = jnp.dtype(cdt).itemsize
    obytes = jnp.dtype(x.dtype).itemsize
    vmem_est = (
        2 * TQ * D * cbytes                                   # x query block (x2 buf)
        + 2 * S_pad * D * cbytes                              # x KV block (x2 buf)
        + 2 * (3 * D * Hhd + Hhd * D_pad) * cbytes            # weights (x2 buf)
        + 2 * (3 * Hhd + D_pad) * 4                           # biases (f32)
        + 2 * TQ * D_pad * obytes                             # out block (x2 buf)
        + 2 * S_pad * Hhd * cbytes + TQ * Hhd * cbytes        # K/V/z scratch
        + 8 * TQ * max(S_pad, Hhd, D_pad) * 4)                # f32 temporaries headroom
    vmem_limit = int(min(64 * 2 ** 20, max(32 * 2 ** 20, 2 * vmem_est)))

    cost = pl.CostEstimate(
        flops=int(2 * B * S * (3 * D * Hhd + 2 * H * S * hd + Hhd * D)),
        transcendentals=int(B * H * S_pad * S_pad),
        bytes_accessed=int(2 * x_c.size * cbytes
                           + (wq_f.size + wk_f.size + wv_f.size + wc_f.size) * cbytes
                           + (bq_f.size + bk_f.size + bv_f.size + bc_f.size) * 4
                           + B * S_pad * D_pad * obytes))

    out = pl.pallas_call(
        kernel,
        out_shape=jax.ShapeDtypeStruct((B, S_pad, D_pad), x.dtype),
        grid=(B, NQ),
        in_specs=[
            pl.BlockSpec((1, TQ, D), lambda b, qi: (b, qi, 0)),       # x (query tile)
            pl.BlockSpec((1, S_pad, D), lambda b, qi: (b, 0, 0)),     # x (full seq, for K/V)
            pl.BlockSpec((D, Hhd), lambda b, qi: (0, 0)),             # W_Q fused (pre-scaled)
            pl.BlockSpec((D, Hhd), lambda b, qi: (0, 0)),             # W_K fused
            pl.BlockSpec((D, Hhd), lambda b, qi: (0, 0)),             # W_V fused
            pl.BlockSpec((1, Hhd), lambda b, qi: (0, 0)),             # b_Q fused (pre-scaled)
            pl.BlockSpec((1, Hhd), lambda b, qi: (0, 0)),             # b_K fused
            pl.BlockSpec((1, Hhd), lambda b, qi: (0, 0)),             # b_V fused
            pl.BlockSpec((Hhd, D_pad), lambda b, qi: (0, 0)),         # W_concat (lane-padded)
            pl.BlockSpec((1, D_pad), lambda b, qi: (0, 0)),           # b_concat (lane-padded)
        ],
        out_specs=pl.BlockSpec((1, TQ, D_pad), lambda b, qi: (b, qi, 0)),
        scratch_shapes=[
            pltpu.VMEM((S_pad, Hhd), cdt),    # K, resident per batch
            pltpu.VMEM((S_pad, Hhd), cdt),    # V, resident per batch
            pltpu.VMEM((TQ, Hhd), cdt),       # per-tile head-output slab
        ],
        compiler_params=pltpu.CompilerParams(
            dimension_semantics=("parallel", "arbitrary"),
            vmem_limit_bytes=vmem_limit),
        cost_estimate=cost,
    )(x_c, x_c, wq_f, wk_f, wv_f, bq_f, bk_f, bv_f, wc_f, bc_f)

    return out[:, :S, :D]


# --------------------------- reference (pure JAX) ------------------------------

def multi_head_attention_ref(x, params):
    wq, wk, wv, bq, bk, bv, wc, bc = params
    H, _, hd = wq.shape
    outs = []
    for h in range(H):
        q = x @ wq[h] + bq[h]
        k = x @ wk[h] + bk[h]
        v = x @ wv[h] + bv[h]
        s = q @ jnp.swapaxes(k, -2, -1) / math.sqrt(hd)
        p = jax.nn.softmax(s, axis=-1)
        outs.append(p @ v)
    z = jnp.concatenate(outs, axis=-1)
    return z @ wc + bc


# ------------------------------- main ------------------------------------------

if __name__ == "__main__":
    batch, seq, model_dim, hidden_dim, nr_heads = 2, 8, 32, 16, 4

    key = jax.random.PRNGKey(0)
    keys = jax.random.split(key, 9)

    def uinit(k, shape, fan_in):
        bound = 1.0 / math.sqrt(fan_in)
        return jax.random.uniform(k, shape, jnp.float32, -bound, bound)

    # Deterministic parameter init (mirrors nn.Linear's uniform init shapes).
    wq = uinit(keys[0], (nr_heads, model_dim, hidden_dim), model_dim)
    wk = uinit(keys[1], (nr_heads, model_dim, hidden_dim), model_dim)
    wv = uinit(keys[2], (nr_heads, model_dim, hidden_dim), model_dim)
    bq = uinit(keys[3], (nr_heads, hidden_dim), model_dim)
    bk = uinit(keys[4], (nr_heads, hidden_dim), model_dim)
    bv = uinit(keys[5], (nr_heads, hidden_dim), model_dim)
    wc = uinit(keys[6], (nr_heads * hidden_dim, model_dim), nr_heads * hidden_dim)
    bc = uinit(keys[7], (model_dim,), nr_heads * hidden_dim)
    params = (wq, wk, wv, bq, bk, bv, wc, bc)

    x = jax.random.normal(keys[8], (batch, seq, model_dim), jnp.float32)

    ref = multi_head_attention_ref(x, params)

    # Validation path: f32 operands + exact reciprocal -> tight tolerance.
    out_f32 = jax.block_until_ready(
        multi_head_attention(x, params, compute_dtype=jnp.float32))
    assert out_f32.shape == (batch, seq, model_dim)
    assert jnp.allclose(out_f32, ref, atol=1e-5, rtol=1e-5), "f32 mismatch vs JAX reference"

    # Default performance path: bf16 operands (MXU-native), f32 softmax/accum.
    out_bf16 = jax.block_until_ready(multi_head_attention(x, params))
    assert out_bf16.shape == (batch, seq, model_dim)
    assert jnp.allclose(out_bf16, ref, atol=5e-2, rtol=5e-2), "bf16 mismatch vs JAX reference"

    print("KERNEL_OK")
</pallas_src>

<mosaic_0001>
module attributes {stable_mosaic.version = 11 : i64} {
  func.func @_fused_mha_kernel(%arg0: i32, %arg1: i32, %arg2: memref<1x8x32xf32, #tpu.memory_space<vmem>>, %arg3: memref<1x8x32xf32, #tpu.memory_space<vmem>>, %arg4: memref<32x64xf32, #tpu.memory_space<vmem>>, %arg5: memref<32x64xf32, #tpu.memory_space<vmem>>, %arg6: memref<32x64xf32, #tpu.memory_space<vmem>>, %arg7: memref<1x64xf32, #tpu.memory_space<vmem>>, %arg8: memref<1x64xf32, #tpu.memory_space<vmem>>, %arg9: memref<1x64xf32, #tpu.memory_space<vmem>>, %arg10: memref<64x128xf32, #tpu.memory_space<vmem>>, %arg11: memref<1x128xf32, #tpu.memory_space<vmem>>, %arg12: memref<1x8x128xf32, #tpu.memory_space<vmem>>, %arg13: memref<8x64xf32, #tpu.memory_space<vmem>>, %arg14: memref<8x64xf32, #tpu.memory_space<vmem>>, %arg15: memref<8x64xf32, #tpu.memory_space<vmem>>) attributes {dimension_semantics = [#tpu.dimension_semantics<parallel>, #tpu.dimension_semantics<arbitrary>], iteration_bounds = array<i64: 2, 1>, scalar_prefetch = 0 : i64, scratch_operands = 3 : i64, tpu.core_type = #tpu.core_type<tc>, window_params = [{transform_indices = @transform_0, window_bounds = array<i64: 1, 8, 32>}, {transform_indices = @transform_1, window_bounds = array<i64: 1, 8, 32>}, {pipeline_mode = #tpu.pipeline_mode<synchronous>, transform_indices = @transform_2, window_bounds = array<i64: 32, 64>}, {pipeline_mode = #tpu.pipeline_mode<synchronous>, transform_indices = @transform_3, window_bounds = array<i64: 32, 64>}, {pipeline_mode = #tpu.pipeline_mode<synchronous>, transform_indices = @transform_4, window_bounds = array<i64: 32, 64>}, {pipeline_mode = #tpu.pipeline_mode<synchronous>, transform_indices = @transform_5, window_bounds = array<i64: 1, 64>}, {pipeline_mode = #tpu.pipeline_mode<synchronous>, transform_indices = @transform_6, window_bounds = array<i64: 1, 64>}, {pipeline_mode = #tpu.pipeline_mode<synchronous>, transform_indices = @transform_7, window_bounds = array<i64: 1, 64>}, {pipeline_mode = #tpu.pipeline_mode<synchronous>, transform_indices = @transform_8, window_bounds = array<i64: 64, 128>}, {pipeline_mode = #tpu.pipeline_mode<synchronous>, transform_indices = @transform_9, window_bounds = array<i64: 1, 128>}, {transform_indices = @transform_10, window_bounds = array<i64: 1, 8, 128>}]} {
    %c0_i32 = arith.constant 0 : i32
    %0 = arith.cmpi eq, %arg1, %c0_i32 : i32
    %1 = arith.extui %0 : i1 to i32
    %c0_i32_0 = arith.constant 0 : i32
    %2 = arith.cmpi ne, %1, %c0_i32_0 : i32
    scf.if %2 {
      %c0_54 = arith.constant 0 : index
      %c0_55 = arith.constant 0 : index
      %c0_56 = arith.constant 0 : index
      %83 = vector.load %arg3[%c0_54, %c0_55, %c0_56] : memref<1x8x32xf32, #tpu.memory_space<vmem>>, vector<1x8x32xf32>
      %84 = vector.shape_cast %83 : vector<1x8x32xf32> to vector<8x32xf32>
      %c0_57 = arith.constant 0 : index
      %c0_58 = arith.constant 0 : index
      %85 = vector.load %arg5[%c0_57, %c0_58] : memref<32x64xf32, #tpu.memory_space<vmem>>, vector<32x64xf32>
      %cst_59 = arith.constant dense<0.000000e+00> : vector<8x64xf32>
      %86 = tpu.matmul %84, %85, %cst_59 {dimension_numbers = #tpu.dot_dimension_numbers<[1], [0], [0], [1], [0, 0, 1, 1], [], []>} : vector<8x32xf32>, vector<32x64xf32>, vector<8x64xf32> -> vector<8x64xf32>
      %c0_60 = arith.constant 0 : index
      %c0_61 = arith.constant 0 : index
      %87 = vector.load %arg8[%c0_60, %c0_61] : memref<1x64xf32, #tpu.memory_space<vmem>>, vector<1x64xf32>
      %88 = vector.broadcast %87 : vector<1x64xf32> to vector<8x64xf32>
      %89 = arith.addf %86, %88 : vector<8x64xf32>
      %c0_62 = arith.constant 0 : index
      %c0_63 = arith.constant 0 : index
      %90 = vector.load %arg6[%c0_62, %c0_63] : memref<32x64xf32, #tpu.memory_space<vmem>>, vector<32x64xf32>
      %cst_64 = arith.constant dense<0.000000e+00> : vector<8x64xf32>
      %91 = tpu.matmul %84, %90, %cst_64 {dimension_numbers = #tpu.dot_dimension_numbers<[1], [0], [0], [1], [0, 0, 1, 1], [], []>} : vector<8x32xf32>, vector<32x64xf32>, vector<8x64xf32> -> vector<8x64xf32>
      %c0_65 = arith.constant 0 : index
      %c0_66 = arith.constant 0 : index
      %92 = vector.load %arg9[%c0_65, %c0_66] : memref<1x64xf32, #tpu.memory_space<vmem>>, vector<1x64xf32>
      %93 = vector.broadcast %92 : vector<1x64xf32> to vector<8x64xf32>
      %94 = arith.addf %91, %93 : vector<8x64xf32>
      %c0_67 = arith.constant 0 : index
      %c0_68 = arith.constant 0 : index
      %95 = vector.load %arg13[%c0_67, %c0_68] : memref<8x64xf32, #tpu.memory_space<vmem>>, vector<8x64xf32>
      tpu.vector_store %arg13[%c0_67, %c0_68], %89 {strides = array<i32>} : memref<8x64xf32, #tpu.memory_space<vmem>>, vector<8x64xf32>,
      %c0_69 = arith.constant 0 : index
      %c0_70 = arith.constant 0 : index
      %96 = vector.load %arg14[%c0_69, %c0_70] : memref<8x64xf32, #tpu.memory_space<vmem>>, vector<8x64xf32>
      tpu.vector_store %arg14[%c0_69, %c0_70], %94 {strides = array<i32>} : memref<8x64xf32, #tpu.memory_space<vmem>>, vector<8x64xf32>,
    } else {
    }
    %c0 = arith.constant 0 : index
    %c0_1 = arith.constant 0 : index
    %c0_2 = arith.constant 0 : index
    %3 = vector.load %arg2[%c0, %c0_1, %c0_2] : memref<1x8x32xf32, #tpu.memory_space<vmem>>, vector<1x8x32xf32>
    %4 = vector.shape_cast %3 : vector<1x8x32xf32> to vector<8x32xf32>
    %c0_3 = arith.constant 0 : index
    %c0_4 = arith.constant 0 : index
    %5 = vector.load %arg4[%c0_3, %c0_4] : memref<32x64xf32, #tpu.memory_space<vmem>>, vector<32x64xf32>
    %cst = arith.constant dense<0.000000e+00> : vector<8x64xf32>
    %6 = tpu.matmul %4, %5, %cst {dimension_numbers = #tpu.dot_dimension_numbers<[1], [0], [0], [1], [0, 0, 1, 1], [], []>} : vector<8x32xf32>, vector<32x64xf32>, vector<8x64xf32> -> vector<8x64xf32>
    %c0_5 = arith.constant 0 : index
    %c0_6 = arith.constant 0 : index
    %7 = vector.load %arg7[%c0_5, %c0_6] : memref<1x64xf32, #tpu.memory_space<vmem>>, vector<1x64xf32>
    %8 = vector.broadcast %7 : vector<1x64xf32> to vector<8x64xf32>
    %9 = arith.addf %6, %8 : vector<8x64xf32>
    %10 = vector.extract_strided_slice %9 {offsets = [0, 0], sizes = [8, 16], strides = [1, 1]} : vector<8x64xf32> to vector<8x16xf32>
    %c0_7 = arith.constant 0 : index
    %c0_8 = arith.constant 0 : index
    %11 = vector.load %arg13[%c0_7, %c0_8] : memref<8x64xf32, #tpu.memory_space<vmem>>, vector<8x16xf32>
    %cst_9 = arith.constant dense<0.000000e+00> : vector<8x8xf32>
    %12 = tpu.matmul %10, %11, %cst_9 {dimension_numbers = #tpu.dot_dimension_numbers<[1], [1], [0], [0], [0, 0, 1, 0], [], []>} : vector<8x16xf32>, vector<8x16xf32>, vector<8x8xf32> -> vector<8x8xf32>
    %cst_10 = arith.constant dense<0xFF800000> : vector<8xf32>
    %13 = vector.multi_reduction <maximumf>, %12, %cst_10 [1] : vector<8x8xf32> to vector<8xf32>
    %14 = vector.shape_cast %13 : vector<8xf32> to vector<8x1xf32>
    %15 = vector.broadcast %14 : vector<8x1xf32> to vector<8x8xf32>
    %16 = arith.subf %12, %15 : vector<8x8xf32>
    %17 = math.exp %16 : vector<8x8xf32>
    %cst_11 = arith.constant dense<0.000000e+00> : vector<8xf32>
    %18 = vector.multi_reduction <add>, %17, %cst_11 [1] : vector<8x8xf32> to vector<8xf32>
    %19 = vector.shape_cast %18 : vector<8xf32> to vector<8x1xf32>
    %20 = tpu.reciprocal %19 : vector<8x1xf32> -> vector<8x1xf32>
    %21 = vector.broadcast %20 : vector<8x1xf32> to vector<8x8xf32>
    %22 = arith.mulf %17, %21 : vector<8x8xf32>
    %c0_12 = arith.constant 0 : index
    %c0_13 = arith.constant 0 : index
    %23 = vector.load %arg14[%c0_12, %c0_13] : memref<8x64xf32, #tpu.memory_space<vmem>>, vector<8x16xf32>
    %cst_14 = arith.constant dense<0.000000e+00> : vector<8x16xf32>
    %24 = tpu.matmul %22, %23, %cst_14 {dimension_numbers = #tpu.dot_dimension_numbers<[1], [0], [0], [1], [0, 0, 1, 1], [], []>} : vector<8x8xf32>, vector<8x16xf32>, vector<8x16xf32> -> vector<8x16xf32>
    %c0_15 = arith.constant 0 : index
    %c0_16 = arith.constant 0 : index
    %25 = vector.load %arg15[%c0_15, %c0_16] : memref<8x64xf32, #tpu.memory_space<vmem>>, vector<8x16xf32>
    tpu.vector_store %arg15[%c0_15, %c0_16], %24 {strides = array<i32>} : memref<8x64xf32, #tpu.memory_space<vmem>>, vector<8x16xf32>,
    %26 = vector.extract_strided_slice %9 {offsets = [0, 16], sizes = [8, 16], strides = [1, 1]} : vector<8x64xf32> to vector<8x16xf32>
    %c0_17 = arith.constant 0 : index
    %c16 = arith.constant 16 : index
    %27 = vector.load %arg13[%c0_17, %c16] : memref<8x64xf32, #tpu.memory_space<vmem>>, vector<8x16xf32>
    %cst_18 = arith.constant dense<0.000000e+00> : vector<8x8xf32>
    %28 = tpu.matmul %26, %27, %cst_18 {dimension_numbers = #tpu.dot_dimension_numbers<[1], [1], [0], [0], [0, 0, 1, 0], [], []>} : vector<8x16xf32>, vector<8x16xf32>, vector<8x8xf32> -> vector<8x8xf32>
    %cst_19 = arith.constant dense<0xFF800000> : vector<8xf32>
    %29 = vector.multi_reduction <maximumf>, %28, %cst_19 [1] : vector<8x8xf32> to vector<8xf32>
    %30 = vector.shape_cast %29 : vector<8xf32> to vector<8x1xf32>
    %31 = vector.broadcast %30 : vector<8x1xf32> to vector<8x8xf32>
    %32 = arith.subf %28, %31 : vector<8x8xf32>
    %33 = math.exp %32 : vector<8x8xf32>
    %cst_20 = arith.constant dense<0.000000e+00> : vector<8xf32>
    %34 = vector.multi_reduction <add>, %33, %cst_20 [1] : vector<8x8xf32> to vector<8xf32>
    %35 = vector.shape_cast %34 : vector<8xf32> to vector<8x1xf32>
    %36 = tpu.reciprocal %35 : vector<8x1xf32> -> vector<8x1xf32>
    %37 = vector.broadcast %36 : vector<8x1xf32> to vector<8x8xf32>
    %38 = arith.mulf %33, %37 : vector<8x8xf32>
    %c0_21 = arith.constant 0 : index
    %c16_22 = arith.constant 16 : index
    %39 = vector.load %arg14[%c0_21, %c16_22] : memref<8x64xf32, #tpu.memory_space<vmem>>, vector<8x16xf32>
    %cst_23 = arith.constant dense<0.000000e+00> : vector<8x16xf32>
    %40 = tpu.matmul %38, %39, %cst_23 {dimension_numbers = #tpu.dot_dimension_numbers<[1], [0], [0], [1], [0, 0, 1, 1], [], []>} : vector<8x8xf32>, vector<8x16xf32>, vector<8x16xf32> -> vector<8x16xf32>
    %c0_24 = arith.constant 0 : index
    %c16_25 = arith.constant 16 : index
    %41 = vector.load %arg15[%c0_24, %c16_25] : memref<8x64xf32, #tpu.memory_space<vmem>>, vector<8x16xf32>
    tpu.vector_store %arg15[%c0_24, %c16_25], %40 {strides = array<i32>} : memref<8x64xf32, #tpu.memory_space<vmem>>, vector<8x16xf32>,
    %42 = vector.extract_strided_slice %9 {offsets = [0, 32], sizes = [8, 16], strides = [1, 1]} : vector<8x64xf32> to vector<8x16xf32>
    %c0_26 = arith.constant 0 : index
    %c32 = arith.constant 32 : index
    %43 = vector.load %arg13[%c0_26, %c32] : memref<8x64xf32, #tpu.memory_space<vmem>>, vector<8x16xf32>
    %cst_27 = arith.constant dense<0.000000e+00> : vector<8x8xf32>
    %44 = tpu.matmul %42, %43, %cst_27 {dimension_numbers = #tpu.dot_dimension_numbers<[1], [1], [0], [0], [0, 0, 1, 0], [], []>} : vector<8x16xf32>, vector<8x16xf32>, vector<8x8xf32> -> vector<8x8xf32>
    %cst_28 = arith.constant dense<0xFF800000> : vector<8xf32>
    %45 = vector.multi_reduction <maximumf>, %44, %cst_28 [1] : vector<8x8xf32> to vector<8xf32>
    %46 = vector.shape_cast %45 : vector<8xf32> to vector<8x1xf32>
    %47 = vector.broadcast %46 : vector<8x1xf32> to vector<8x8xf32>
    %48 = arith.subf %44, %47 : vector<8x8xf32>
    %49 = math.exp %48 : vector<8x8xf32>
    %cst_29 = arith.constant dense<0.000000e+00> : vector<8xf32>
    %50 = vector.multi_reduction <add>, %49, %cst_29 [1] : vector<8x8xf32> to vector<8xf32>
    %51 = vector.shape_cast %50 : vector<8xf32> to vector<8x1xf32>
    %52 = tpu.reciprocal %51 : vector<8x1xf32> -> vector<8x1xf32>
    %53 = vector.broadcast %52 : vector<8x1xf32> to vector<8x8xf32>
    %54 = arith.mulf %49, %53 : vector<8x8xf32>
    %c0_30 = arith.constant 0 : index
    %c32_31 = arith.constant 32 : index
    %55 = vector.load %arg14[%c0_30, %c32_31] : memref<8x64xf32, #tpu.memory_space<vmem>>, vector<8x16xf32>
    %cst_32 = arith.constant dense<0.000000e+00> : vector<8x16xf32>
    %56 = tpu.matmul %54, %55, %cst_32 {dimension_numbers = #tpu.dot_dimension_numbers<[1], [0], [0], [1], [0, 0, 1, 1], [], []>} : vector<8x8xf32>, vector<8x16xf32>, vector<8x16xf32> -> vector<8x16xf32>
    %c0_33 = arith.constant 0 : index
    %c32_34 = arith.constant 32 : index
    %57 = vector.load %arg15[%c0_33, %c32_34] : memref<8x64xf32, #tpu.memory_space<vmem>>, vector<8x16xf32>
    tpu.vector_store %arg15[%c0_33, %c32_34], %56 {strides = array<i32>} : memref<8x64xf32, #tpu.memory_space<vmem>>, vector<8x16xf32>,
    %58 = vector.extract_strided_slice %9 {offsets = [0, 48], sizes = [8, 16], strides = [1, 1]} : vector<8x64xf32> to vector<8x16xf32>
    %c0_35 = arith.constant 0 : index
    %c48 = arith.constant 48 : index
    %59 = vector.load %arg13[%c0_35, %c48] : memref<8x64xf32, #tpu.memory_space<vmem>>, vector<8x16xf32>
    %cst_36 = arith.constant dense<0.000000e+00> : vector<8x8xf32>
    %60 = tpu.matmul %58, %59, %cst_36 {dimension_numbers = #tpu.dot_dimension_numbers<[1], [1], [0], [0], [0, 0, 1, 0], [], []>} : vector<8x16xf32>, vector<8x16xf32>, vector<8x8xf32> -> vector<8x8xf32>
    %cst_37 = arith.constant dense<0xFF800000> : vector<8xf32>
    %61 = vector.multi_reduction <maximumf>, %60, %cst_37 [1] : vector<8x8xf32> to vector<8xf32>
    %62 = vector.shape_cast %61 : vector<8xf32> to vector<8x1xf32>
    %63 = vector.broadcast %62 : vector<8x1xf32> to vector<8x8xf32>
    %64 = arith.subf %60, %63 : vector<8x8xf32>
    %65 = math.exp %64 : vector<8x8xf32>
    %cst_38 = arith.constant dense<0.000000e+00> : vector<8xf32>
    %66 = vector.multi_reduction <add>, %65, %cst_38 [1] : vector<8x8xf32> to vector<8xf32>
    %67 = vector.shape_cast %66 : vector<8xf32> to vector<8x1xf32>
    %68 = tpu.reciprocal %67 : vector<8x1xf32> -> vector<8x1xf32>
    %69 = vector.broadcast %68 : vector<8x1xf32> to vector<8x8xf32>
    %70 = arith.mulf %65, %69 : vector<8x8xf32>
    %c0_39 = arith.constant 0 : index
    %c48_40 = arith.constant 48 : index
    %71 = vector.load %arg14[%c0_39, %c48_40] : memref<8x64xf32, #tpu.memory_space<vmem>>, vector<8x16xf32>
    %cst_41 = arith.constant dense<0.000000e+00> : vector<8x16xf32>
    %72 = tpu.matmul %70, %71, %cst_41 {dimension_numbers = #tpu.dot_dimension_numbers<[1], [0], [0], [1], [0, 0, 1, 1], [], []>} : vector<8x8xf32>, vector<8x16xf32>, vector<8x16xf32> -> vector<8x16xf32>
    %c0_42 = arith.constant 0 : index
    %c48_43 = arith.constant 48 : index
    %73 = vector.load %arg15[%c0_42, %c48_43] : memref<8x64xf32, #tpu.memory_space<vmem>>, vector<8x16xf32>
    tpu.vector_store %arg15[%c0_42, %c48_43], %72 {strides = array<i32>} : memref<8x64xf32, #tpu.memory_space<vmem>>, vector<8x16xf32>,
    %c0_44 = arith.constant 0 : index
    %c0_45 = arith.constant 0 : index
    %74 = vector.load %arg15[%c0_44, %c0_45] : memref<8x64xf32, #tpu.memory_space<vmem>>, vector<8x64xf32>
    %c0_46 = arith.constant 0 : index
    %c0_47 = arith.constant 0 : index
    %75 = vector.load %arg10[%c0_46, %c0_47] : memref<64x128xf32, #tpu.memory_space<vmem>>, vector<64x128xf32>
    %cst_48 = arith.constant dense<0.000000e+00> : vector<8x128xf32>
    %76 = tpu.matmul %74, %75, %cst_48 {dimension_numbers = #tpu.dot_dimension_numbers<[1], [0], [0], [1], [0, 0, 1, 1], [], []>} : vector<8x64xf32>, vector<64x128xf32>, vector<8x128xf32> -> vector<8x128xf32>
    %c0_49 = arith.constant 0 : index
    %c0_50 = arith.constant 0 : index
    %77 = vector.load %arg11[%c0_49, %c0_50] : memref<1x128xf32, #tpu.memory_space<vmem>>, vector<1x128xf32>
    %78 = vector.broadcast %77 : vector<1x128xf32> to vector<8x128xf32>
    %79 = arith.addf %76, %78 : vector<8x128xf32>
    %c0_51 = arith.constant 0 : index
    %c0_52 = arith.constant 0 : index
    %c0_53 = arith.constant 0 : index
    %80 = vector.load %arg12[%c0_51, %c0_52, %c0_53] : memref<1x8x128xf32, #tpu.memory_space<vmem>>, vector<1x8x128xf32>
    %81 = vector.shape_cast %80 : vector<1x8x128xf32> to vector<8x128xf32>
    %82 = vector.shape_cast %79 : vector<8x128xf32> to vector<1x8x128xf32>
    tpu.vector_store %arg12[%c0_51, %c0_52, %c0_53], %82 {strides = array<i32>} : memref<1x8x128xf32, #tpu.memory_space<vmem>>, vector<1x8x128xf32>,
    return
  }
  func.func @transform_0(%arg0: i32, %arg1: i32) -> (i32, i32, i32) {
    %c0_i32 = arith.constant 0 : i32
    %c0_i32_0 = arith.constant 0 : i32
    return %arg0, %arg1, %c0_i32 : i32, i32, i32
  }
  func.func @transform_1(%arg0: i32, %arg1: i32) -> (i32, i32, i32) {
    %c0_i32 = arith.constant 0 : i32
    %c0_i32_0 = arith.constant 0 : i32
    %c0_i32_1 = arith.constant 0 : i32
    return %arg0, %c0_i32, %c0_i32_0 : i32, i32, i32
  }
  func.func @transform_2(%arg0: i32, %arg1: i32) -> (i32, i32) {
    %c0_i32 = arith.constant 0 : i32
    %c0_i32_0 = arith.constant 0 : i32
    %c0_i32_1 = arith.constant 0 : i32
    return %c0_i32, %c0_i32_0 : i32, i32
  }
  func.func @transform_3(%arg0: i32, %arg1: i32) -> (i32, i32) {
    %c0_i32 = arith.constant 0 : i32
    %c0_i32_0 = arith.constant 0 : i32
    %c0_i32_1 = arith.constant 0 : i32
    return %c0_i32, %c0_i32_0 : i32, i32
  }
  func.func @transform_4(%arg0: i32, %arg1: i32) -> (i32, i32) {
    %c0_i32 = arith.constant 0 : i32
    %c0_i32_0 = arith.constant 0 : i32
    %c0_i32_1 = arith.constant 0 : i32
    return %c0_i32, %c0_i32_0 : i32, i32
  }
  func.func @transform_5(%arg0: i32, %arg1: i32) -> (i32, i32) {
    %c0_i32 = arith.constant 0 : i32
    %c0_i32_0 = arith.constant 0 : i32
    %c0_i32_1 = arith.constant 0 : i32
    return %c0_i32, %c0_i32_0 : i32, i32
  }
  func.func @transform_6(%arg0: i32, %arg1: i32) -> (i32, i32) {
    %c0_i32 = arith.constant 0 : i32
    %c0_i32_0 = arith.constant 0 : i32
    %c0_i32_1 = arith.constant 0 : i32
    return %c0_i32, %c0_i32_0 : i32, i32
  }
  func.func @transform_7(%arg0: i32, %arg1: i32) -> (i32, i32) {
    %c0_i32 = arith.constant 0 : i32
    %c0_i32_0 = arith.constant 0 : i32
    %c0_i32_1 = arith.constant 0 : i32
    return %c0_i32, %c0_i32_0 : i32, i32
  }
  func.func @transform_8(%arg0: i32, %arg1: i32) -> (i32, i32) {
    %c0_i32 = arith.constant 0 : i32
    %c0_i32_0 = arith.constant 0 : i32
    %c0_i32_1 = arith.constant 0 : i32
    return %c0_i32, %c0_i32_0 : i32, i32
  }
  func.func @transform_9(%arg0: i32, %arg1: i32) -> (i32, i32) {
    %c0_i32 = arith.constant 0 : i32
    %c0_i32_0 = arith.constant 0 : i32
    %c0_i32_1 = arith.constant 0 : i32
    return %c0_i32, %c0_i32_0 : i32, i32
  }
  func.func @transform_10(%arg0: i32, %arg1: i32) -> (i32, i32, i32) {
    %c0_i32 = arith.constant 0 : i32
    %c0_i32_0 = arith.constant 0 : i32
    return %arg0, %arg1, %c0_i32 : i32, i32, i32
  }
}

</mosaic_0001>

<bundles_post_ra>
// kernel: tpu_custom_call.1
= control target key start
LH: loop header
LB: loop body
LE: loop exit
PB: predicated region body
PF: predicated region fallthrough
CT: control target
= control target key end

     0   :  { %s2810_s0 = inlined_call_operand.hbm [shape: f32[2,8,32], index: 0, kind: input, shape index: {}]   ;;  %s2811_s1 = inlined_call_operand.hbm [shape: f32[2,8,32], index: 1, kind: input, shape index: {}]   ;;  %s2812_s2 = inlined_call_operand.hbm [shape: f32[32,64], index: 2, kind: input, shape index: {}]   ;;  %s2813_s3 = inlined_call_operand.hbm [shape: f32[32,64], index: 3, kind: input, shape index: {}]   ;;  %s2814_s4 = inlined_call_operand.hbm [shape: f32[32,64], index: 4, kind: input, shape index: {}]   ;;  %s2815_s5 = inlined_call_operand.vmem [shape: f32[1,64], index: 5, kind: input, shape index: {}]   ;;  %s2816_s6 = inlined_call_operand.vmem [shape: f32[1,64], index: 6, kind: input, shape index: {}]   ;;  %s2817_s7 = inlined_call_operand.vmem [shape: f32[1,64], index: 7, kind: input, shape index: {}]   ;;  %s2818_s8 = inlined_call_operand.hbm [shape: f32[64,128], index: 8, kind: input, shape index: {}]   ;;  %s2819_s9 = inlined_call_operand.vmem [shape: f32[1,128], index: 9, kind: input, shape index: {}]   ;;  %s2820_s10 = inlined_call_operand.hbm [shape: f32[2,8,128], index: 10, kind: output, shape index: {}]  }
   0x1   :  { %2827 = sst [smem:[#allocation25_spill]] %s2812_s2 }
   0x2   :  { %2828 = sst [smem:[#allocation26_spill]] %s2813_s3 }
   0x3   :  { %2829 = sst [smem:[#allocation27_spill]] %s2814_s4 }
   0x4   :  { %2830 = sst [smem:[#allocation28_spill]] %s2817_s7 }
   0x5   :  { %2831 = sst [smem:[#allocation29_spill]] %s2818_s8 }
   0x6   :  { %2832 = sst [smem:[#allocation30_spill]] %s2819_s9 }
   0x7   :  { %2833 = sst [smem:[#allocation31_spill]] %s2820_s10 }
   0x8   :  { %15 = vsyncpa [#allocation6], 0 }
   0x9   :  { %17 = vsyncpa [#allocation6 + $0x1], 0 }
   0xa   :  { %18 = vsyncpa [#allocation9], 0 }
   0xb   :  { %20 = vsyncpa [#allocation9 + $0x1], 0 }
   0xc   :  { %21 = vsyncpa [#allocation12], 0 }
   0xd   :  { %22 = vsyncpa [#allocation15], 0 }
   0xe   :  { %23 = vsyncpa [#allocation7], 0 }
   0xf   :  { %25 = vsyncpa [#allocation7 + $0x1], 0  ;;  %s2370_s13 = smov 0   ;;  %s2372_s14 = smov 0  }
  0x10   :  { %s2374_s15 = smov 0   ;;  %s2376_s16 = smov 0  }
  0x11   :  { %s2378_s17 = smov 0   ;;  %s2380_s18 = smov 0  }
  0x12 LB: > { %2834 = sst [smem:[#allocation23_spill]] %s2287_s16  ;;  %s2401_s19 = sadd.s32 4294967295, %s2295_s18   ;;  %s2295_s18 = sphi %s2380_s18, %s31_s18   ;;  %s2291_s17 = sphi %s2378_s17, %s2869_s17   ;;  %s2287_s16 = sphi %s2376_s16, %s2868_s16   ;;  %s2283_s15 = sphi %s2374_s15, %s2867_s15   ;;  %s2279_s14 = sphi %s2372_s14, %s2866_s14   ;;  %s2275_s13 = sphi %s2370_s13, %s2865_s13  }
  0x13   : > { %p1686_p0 = scmp.ge.s32.totalorder %s2295_s18, 1  ;;  %p2822_p1 = scmp.eq.s32.totalorder %s2401_s19, 0 }
  0x14   : > { %p298_p2 = scmp.lt.s32.totalorder %s2295_s18, 3  ;;  %s2297_s21 = smov [#allocation10]  }
  0x15   : > { %s310_s22 = sshll.u32 %s2297_s21, 4  ;;  %s2298_s24 = smov [#allocation11]   ;;  %s2410_s22 = int_to_ptr.vmem [resolvable:$true] %s310_s22 }
  0x16   : > { %p2406_p3 = pnand %p1686_p0, %p298_p2  ;;  %s323_s25 = sshll.u32 %s2298_s24, 4  ;;  %s2421_s25 = int_to_ptr.vmem [resolvable:$true] %s323_s25 }
  0x17   : > { %s2299_s26 = smov [#allocation13]   ;;  %s2837_s2 = sld [smem:[#allocation25_spill]] }
  0x18   : > { %s2835_s20 = scalar_select %p2406_p3, 1, 0 }
  0x19   : > { %p1912_p4 = pneg %p2406_p3  ;;  %s2423_s27 = sshll.u32 %s2299_s26, 4  ;;  %s337_s27 = int_to_ptr.vmem [resolvable:$true] %s2423_s27 }
  0x1b   : > { %p2417_p6 = pnand %p1912_p4, %p2822_p1 }
  0x1d   : > { %s2025_s30 = scalar_lea.hbm %s2837_s2, 512  ;;  %p2433_p8 = pneg %p2417_p6 }
  0x1e   : > { %p2026_p7 = scmp.ne.s32.totalorder %s2837_s2, %s2025_s30  ;;  %p2032_p11 = scmp.lt.u32.totalorder %s2025_s30, %s2837_s2 }
  0x20   : > { %p2028_p9 = pnand %p2433_p8, %p2026_p7 }
  0x22   : > { %p2029_p10 = pneg %p2028_p9 }
  0x24   : > { %p2034_p12 = pnand %p2032_p11, %p2029_p10 }
  0x26   : > { %2037 = shalt.err (!%p2034_p12)
}
  0x27   : > { %s2038_s28 = scalar_lea.vmem %s2410_s22, 512  ;;  %p2046_p4 = scmp.lt.s32.totalorder %s2410_s22, %s2410_s22 }
  0x28   : > { %p2039_p13 = scmp.ne.s32.totalorder %s2410_s22, %s2038_s28  ;;  %p2047_p5 = scmp.lt.s32.totalorder %s2038_s28, %s2038_s28 }
  0x2a   : > { %p2041_p0 = pnand %p2039_p13, %p2433_p8  ;;  %p2048_p7 = por %p2047_p5, %p2046_p4 }
  0x2c   : > { %p2042_p2 = pneg %p2041_p0 }
  0x2e   : > { %p2049_p9 = pnand %p2048_p7, %p2042_p2 }
  0x30   : > { %2052 = shalt.err (!%p2049_p9)
}
  0x31   : > { %s2300_s29 = smov 128   ;;  %s2301_s30 = smov 8  }
  0x32   : > { %1915 = dma.hbm_to_vmem [thread:$0]  (!%p2417_p6), %s2837_s2, 512, %s2410_s22, [#allocation9], %s2300_s29, %s2300_s29, %s2301_s30  }
  0x33   : > { %s2839_s3 = sld [smem:[#allocation26_spill]] }
  0x39   : > { %s2053_s28 = scalar_lea.hbm %s2839_s3, 512 }
  0x3a   : > { %p2054_p5 = scmp.ne.s32.totalorder %s2839_s3, %s2053_s28  ;;  %p2060_p12 = scmp.lt.u32.totalorder %s2053_s28, %s2839_s3 }
  0x3c   : > { %p2056_p10 = pnand %p2054_p5, %p2433_p8 }
  0x3e   : > { %p2057_p11 = pneg %p2056_p10 }
  0x40   : > { %p2062_p13 = pnand %p2060_p12, %p2057_p11 }
  0x42   : > { %2065 = shalt.err (!%p2062_p13)
}
  0x43   : > { %s2066_s22 = scalar_lea.vmem %s2421_s25, 512  ;;  %p2074_p7 = scmp.lt.s32.totalorder %s2421_s25, %s2421_s25 }
  0x44   : > { %p2067_p0 = scmp.ne.s32.totalorder %s2421_s25, %s2066_s22  ;;  %p2075_p9 = scmp.lt.s32.totalorder %s2066_s22, %s2066_s22 }
  0x46   : > { %p2069_p2 = pnand %p2067_p0, %p2433_p8  ;;  %p2076_p5 = por %p2075_p9, %p2074_p7 }
  0x48   : > { %p2070_p4 = pneg %p2069_p2 }
  0x4a   : > { %p2077_p10 = pnand %p2076_p5, %p2070_p4 }
  0x4c   : > { %2080 = shalt.err (!%p2077_p10)
}
  0x4d   : > { %1918 = dma.hbm_to_vmem [thread:$0]  (!%p2417_p6), %s2839_s3, 512, %s2421_s25, [#allocation12], %s2300_s29, %s2300_s29, %s2301_s30  }
  0x4e   : > { %s2840_s4 = sld [smem:[#allocation27_spill]] }
  0x54   : > { %s2081_s11 = scalar_lea.hbm %s2840_s4, 512 }
  0x55   : > { %p2082_p11 = scmp.ne.s32.totalorder %s2840_s4, %s2081_s11  ;;  %p2088_p0 = scmp.lt.u32.totalorder %s2081_s11, %s2840_s4 }
  0x57   : > { %p2084_p12 = pnand %p2082_p11, %p2433_p8 }
  0x59   : > { %p2085_p13 = pneg %p2084_p12 }
  0x5b   : > { %p2090_p2 = pnand %p2088_p0, %p2085_p13 }
  0x5d   : > { %2093 = shalt.err (!%p2090_p2)
}
  0x5e   : > { %s2094_s22 = scalar_lea.vmem %s337_s27, 512  ;;  %p2102_p5 = scmp.lt.s32.totalorder %s337_s27, %s337_s27 }
  0x5f   : > { %p2095_p4 = scmp.ne.s32.totalorder %s337_s27, %s2094_s22  ;;  %p2103_p10 = scmp.lt.s32.totalorder %s2094_s22, %s2094_s22 }
  0x61   : > { %p2097_p7 = pnand %p2095_p4, %p2433_p8  ;;  %p2104_p1 = por %p2103_p10, %p2102_p5 }
  0x63   : > { %p2098_p9 = pneg %p2097_p7 }
  0x65   : > { %p2105_p3 = pnand %p2104_p1, %p2098_p9 }
  0x67   : > { %2108 = shalt.err (!%p2105_p3)
}
  0x68   : > { %1921 = dma.hbm_to_vmem [thread:$0]  (!%p2417_p6), %s2840_s4, 512, %s337_s27, [#allocation12], %s2300_s29, %s2300_s29, %s2301_s30  }
  0x69   : > { %s2302_s9 = smov [#allocation14]   ;;  %s2841_s8 = sld [smem:[#allocation29_spill]] }
  0x6a   : > { %s358_s10 = sshll.u32 %s2302_s9, 4  ;;  %s359_s10 = int_to_ptr.vmem [resolvable:$true] %s358_s10 }
  0x6f   : > { %s2109_s12 = scalar_lea.hbm %s2841_s8, 1024 }
  0x70   : > { %p2110_p1 = scmp.ne.s32.totalorder %s2841_s8, %s2109_s12  ;;  %p2116_p12 = scmp.lt.u32.totalorder %s2109_s12, %s2841_s8 }
  0x72   : > { %p2112_p3 = pnand %p2110_p1, %p2433_p8 }
  0x74   : > { %p2113_p11 = pneg %p2112_p3 }
  0x76   : > { %p2118_p13 = pnand %p2116_p12, %p2113_p11 }
  0x78   : > { %2121 = shalt.err (!%p2118_p13)
}
  0x79   : > { %s2122_s27 = scalar_lea.vmem %s359_s10, 1024  ;;  %p2130_p7 = scmp.lt.s32.totalorder %s359_s10, %s359_s10 }
  0x7a   : > { %p2123_p0 = scmp.ne.s32.totalorder %s359_s10, %s2122_s27  ;;  %p2131_p9 = scmp.lt.s32.totalorder %s2122_s27, %s2122_s27 }
  0x7c   : > { %p2125_p2 = pnand %p2123_p0, %p2433_p8  ;;  %p2132_p5 = por %p2131_p9, %p2130_p7 }
  0x7e   : > { %p2126_p4 = pneg %p2125_p2 }
  0x80   : > { %p2133_p10 = pnand %p2132_p5, %p2126_p4 }
  0x82   : > { %2136 = shalt.err (!%p2133_p10)
}
  0x83   : > { %1924 = dma.hbm_to_vmem [thread:$0]  (!%p2417_p6), %s2841_s8, 1024, %s359_s10, [#allocation15], %s2300_s29, %s2300_s29, %s2301_s30  }
  0x84   : > { %s1685_s23 = sadd.s32 4294967294, %s2295_s18   ;;  %s43_s21 = sadd.s32 1, %s2291_s17 }
  0x85   : > { %p45_p8 = scmp.ge.s32.totalorder %s43_s21, 2  ;;  %s52_s9 = sadd.s32 1, %s2283_s15 }
  0x86   : > { %p59_p1 = scmp.ne.s32.totalorder %s2283_s15, %s2279_s14  ;;  %p60_p3 = scmp.eq.s32.totalorder %s2295_s18, 0 }
  0x87   : > { %s2871_s21 = smov (%p45_p8, %s43_s21), 0  ;;  %p65_p12 = scmp.ne.s32.totalorder %s2279_s14, %s2275_s13 }
  0x88   : > { %2842 = sst [smem:[#allocation24_spill]] %s2871_s21  ;;  %p2534_p11 = por %p60_p3, %p59_p1 }
  0x89   : > { %s47_s29 = ssub.s32 %s2291_s17, %s2871_s21  ;;  %p285_p6 = scmp.eq.s32.totalorder %s2401_s19, 1 }
  0x8a   : > { %p50_p13 = scmp.eq.s32.totalorder %s47_s29, 0  ;;  %p2844_p0 = scmp.eq.s32.totalorder %s2401_s19, 0 }
  0x8b   : > { %p2549_p4 = por %p285_p6, %p59_p1  ;;  %p291_p7 = scmp.eq.s32.totalorder %s1685_s23, 1 }
  0x8c   : > { %p2545_p2 = por %p2844_p0, %p65_p12  ;;  %p1940_p5 = scmp.lt.s32.totalorder %s2295_s18, 2 }
  0x8d   : > { %s2846_s10 = scalar_select %p2549_p4, 1, 0 }
  0x8e   : > { %s2845_s30 = scalar_select %p2545_p2, 1, 0 }
  0x8f   : > { %s2554_s11 = scalar_select %p50_p13, %s2283_s15, %s52_s9  }
  0x90   : > { %p2556_p9 = por %p291_p7, %p65_p12  ;;  %s375_s24 = sand.u32 1, %s2283_s15  }
  0x91   : > { %s1693_s26 = sshll.u32 %s2291_s17, 7  ;;  %s2563_s28 = sshll.u32 %s375_s24, 3 }
  0x92   : > { %s2847_s12 = scalar_select %p2556_p9, 1, 0 }
  0x93   : > { %s2568_s25 = scalar_lea.hbm %s2810_s0, %s1693_s26  ;;  %s379_s7 = scalar_lea.vmem [#allocation5], %s2563_s28 }
  0x94   : > { %s387_s23 = sshll.u32 %s379_s7, 4  ;;  %p2573_p10 = pnand %p1940_p5, %p2534_p11  ;;  %s2577_s23 = int_to_ptr.vmem [resolvable:$true] %s387_s23 }
  0x95   : > { %s2582_s27 = scalar_lea.hbm %s2811_s1, %s1693_s26  ;;  %s376_s2 = scalar_lea.sflag [#allocation6], %s375_s24 }
  0x96   : > { %s2137_s3 = scalar_lea.hbm %s2568_s25, 128  ;;  %p2139_p1 = pneg %p2573_p10 }
  0x97   : > { %p2138_p8 = scmp.ne.s32.totalorder %s2568_s25, %s2137_s3  ;;  %s2142_s4 = scalar_lea.hbm %s2810_s0, 256 }
  0x98   : > { %p2143_p12 = scmp.lt.u32.totalorder %s2568_s25, %s2810_s0  ;;  %p2144_p6 = scmp.lt.u32.totalorder %s2142_s4, %s2137_s3 }
  0x99   : > { %p2140_p3 = pnand %p2139_p1, %p2138_p8  ;;  %p2146_p0 = scmp.lt.u32.totalorder %s2137_s3, %s2568_s25 }
  0x9a   : > { %p2145_p13 = por %p2144_p6, %p2143_p12 }
  0x9b   : > { %p2141_p11 = pneg %p2140_p3 }
  0x9c   : > { %p2147_p7 = por %p2146_p0, %p2145_p13 }
  0x9e   : > { %p2148_p5 = pnand %p2147_p7, %p2141_p11 }
  0xa0   : > { %2151 = shalt.err (!%p2148_p5)
}
  0xa1   : > { %s2152_s24 = scalar_lea.vmem %s2577_s23, 128  ;;  %s2303_s26 = smov [#allocation5]  }
  0xa2   : > { %p2153_p8 = scmp.ne.s32.totalorder %s2577_s23, %s2152_s24  ;;  %s2157_s29 = sshll.u32 %s2303_s26, 4  ;;  %s2158_s29 = int_to_ptr.vmem [resolvable:$false] %s2157_s29 }
  0xa3   : > { %s2159_s8 = scalar_lea.vmem %s2158_s29, 256  ;;  %p2160_p4 = scmp.lt.s32.totalorder %s2577_s23, %s2158_s29 }
  0xa4   : > { %p2155_p3 = pnand %p2153_p8, %p2139_p1  ;;  %p2161_p12 = scmp.lt.s32.totalorder %s2159_s8, %s2152_s24 }
  0xa6   : > { %p2156_p9 = pneg %p2155_p3  ;;  %p2162_p6 = por %p2161_p12, %p2160_p4 }
  0xa8   : > { %p2163_p13 = pnand %p2162_p6, %p2156_p9 }
  0xaa   : > { %2166 = shalt.err (!%p2163_p13)
}
  0xab   : > { %1928 = dma.hbm_to_vmem [thread:$0]  (!%p2573_p10), %s2568_s25, 128, %s2577_s23, %s376_s2  }
  0xac   : > { %s394_s3 = sand.u32 1, %s2295_s18   ;;  %s398_s4 = scalar_lea.vmem [#allocation8], %s2563_s28 }
  0xad   : > { %s405_s21 = sshll.u32 %s398_s4, 4  ;;  %s395_s22 = scalar_lea.sflag [#allocation9], %s394_s3  ;;  %s406_s21 = int_to_ptr.vmem [resolvable:$true] %s405_s21 }
  0xae   : > { %s2167_s16 = scalar_lea.hbm %s2582_s27, 128  ;;  %s2172_s26 = scalar_lea.hbm %s2811_s1, 256 }
  0xaf   : > { %p2168_p4 = scmp.ne.s32.totalorder %s2582_s27, %s2167_s16  ;;  %p2173_p0 = scmp.lt.u32.totalorder %s2582_s27, %s2811_s1 }
  0xb0   : > { %p2174_p7 = scmp.lt.u32.totalorder %s2172_s26, %s2167_s16  ;;  %p2176_p8 = scmp.lt.u32.totalorder %s2167_s16, %s2582_s27 }
  0xb1   : > { %p2170_p9 = pnand %p2168_p4, %p2139_p1 }
  0xb2   : > { %p2175_p5 = por %p2174_p7, %p2173_p0 }
  0xb3   : > { %p2171_p11 = pneg %p2170_p9 }
  0xb4   : > { %p2177_p3 = por %p2176_p8, %p2175_p5 }
  0xb6   : > { %p2178_p12 = pnand %p2177_p3, %p2171_p11 }
  0xb8   : > { %2181 = shalt.err (!%p2178_p12)
}
  0xb9   : > { %s2182_s2 = scalar_lea.vmem %s406_s21, 128  ;;  %s2304_s28 = smov [#allocation8]  }
  0xba   : > { %p2183_p6 = scmp.ne.s32.totalorder %s406_s21, %s2182_s2  ;;  %s2187_s25 = sshll.u32 %s2304_s28, 4  ;;  %s2188_s25 = int_to_ptr.vmem [resolvable:$false] %s2187_s25 }
  0xbb   : > { %s2189_s23 = scalar_lea.vmem %s2188_s25, 256  ;;  %p2190_p9 = scmp.lt.s32.totalorder %s406_s21, %s2188_s25 }
  0xbc   : > { %p2185_p13 = pnand %p2183_p6, %p2139_p1  ;;  %p2191_p2 = scmp.lt.s32.totalorder %s2189_s23, %s2182_s2 }
  0xbe   : > { %p2186_p4 = pneg %p2185_p13  ;;  %p2192_p0 = por %p2191_p2, %p2190_p9 }
  0xc0   : > { %p2193_p7 = pnand %p2192_p0, %p2186_p4 }
  0xc2   : > { %2196 = shalt.err (!%p2193_p7)
}
  0xc3   : > { %1931 = dma.hbm_to_vmem [thread:$0]  (!%p2573_p10), %s2582_s27, 128, %s406_s21, %s395_s22  }
  0xc4   : > { %p2849_p11 = scmp.ne.s32.totalorder %s2835_s20, 0 }
  0xc5   : > { %s2633_s3 = sand.u32 (!%p2849_p11), 1, %s2279_s14   ;;  %p2850_p2 = scmp.ne.s32.totalorder (!%p2849_p11), %s2845_s30, 0 }
  0xc6   : > { %414 = sbr.rel (%p2849_p11) target bundleno = 1669 (0x685), region = 60  ;;  %s2636_s4 = sshll.u32 (!%p2849_p11), %s2633_s3, 3 }
  0xc7   : > { %s417_s16 = scalar_lea.sflag (!%p2849_p11), [#allocation6], %s2633_s3  ;;  %s420_s7 = scalar_lea.vmem (!%p2849_p11), [#allocation5], %s2636_s4 }
  0xcd   : > { %2250 = dma.done.wait (%p2850_p2), %s417_s16, 128  }
  0xce   : > { %2252 = vsyncadd (%p2850_p2), %s417_s16, 4294967168  ;;  %s425_s20 = sand.u32 1, %s2401_s19   ;;  %s429_s27 = scalar_lea.vmem [#allocation8], %s2636_s4 }
  0xcf   : > { %s426_s9 = scalar_lea.sflag [#allocation9], %s425_s20 }
  0xd0   : > { %2254 = dma.done.wait (%p2850_p2), %s426_s9, 128  }
  0xd1   : > { %2256 = vsyncadd (%p2850_p2), %s426_s9, 4294967168  ;;  %p2851_p10 = scmp.eq.s32.totalorder %s2401_s19, 0 }
  0xd3   : > { %2258 = dma.done.wait (%p2851_p10), [#allocation9], 512   ;;  %p2852_p1 = pmov %p2851_p10 }
  0xd5   : > { %2260 = vsyncadd (%p2852_p1), [#allocation9], 4294966784  ;;  %p2853_p5 = pmov %p2852_p1 }
  0xd6   : > { %p2854_p8 = pmov %p2852_p1 }
  0xd7   : > { %2262 = dma.done.wait (%p2853_p5), [#allocation12], 1024  }
  0xd8   : > { %2264 = vsyncadd (%p2854_p8), [#allocation12], 4294966272  ;;  %p2855_p3 = pmov %p2852_p1 }
  0xd9   : > { %p2856_p12 = pmov %p2852_p1 }
  0xda   : > { %2266 = dma.done.wait (%p2855_p3), [#allocation15], 1024  }
  0xdb   : > { %2268 = vsyncadd (%p2856_p12), [#allocation15], 4294966272  ;;  %v2305_v0 = vmov 0.0|0.0   ;;  %vm2306_vm0 = vmmov 0   ;;  %v2307_v1 = vmov 0.0   ;;  %v492_v2 = vld [vmem:[#allocation11] sm:$0xff] }
  0xdc   : > { %1860 = vmatprep.subr.bf16.mxu1 %v2305_v0  ;;  %1776 = vmatprep.mubr.msk.f32.mxu1 %vm2306_vm0, %v2307_v1  ;;  %v493_v3 = vld [vmem:[#allocation11 + $0x8] sm:$0xff]  ;;  %v494_v4 = vld [vmem:[#allocation11 + $0x10] sm:$0xff]  ;;  %v495_v6 = vld [vmem:[#allocation11 + $0x18] sm:$0xff]  ;;  %vm503_vm1 = vcmask 261120   ;;  %vm658_vm2 = vcmask 523264   ;;  %vm748_vm3 = vcmask 130048  }
  0xdd   : > { %1872 = vmatprep.subr.bf16.mxu0 %v2305_v0  ;;  %1798 = vmatprep.mubr.msk.f32.mxu0 %vm2306_vm0, %v2307_v1  ;;  %v1861_v5 = vpack.c.bf16 %v493_v3, %v492_v2  ;;  %v662_v7 = vld [vmem:[#allocation10] sm:$0xff]  ;;  %v663_v8 = vld [vmem:[#allocation10 + $0x8] sm:$0xff]  ;;  %v664_v9 = vld [vmem:[#allocation10 + $0x10] sm:$0xff]  ;;  %v1864_v11 = vpack.c.bf16 %v495_v6, %v494_v4  ;;  %s2308_s24 = smov 96   ;;  %s2309_s26 = smov 112   ;;  %vm825_vm4 = vcmask 64512  }
  0xde   : > { %v665_v10 = vld [vmem:[#allocation10 + $0x18] sm:$0xff]  ;;  %v1873_v12 = vpack.c.bf16 %v663_v8, %v662_v7  ;;  %v577_v13 = vld [vmem:[#allocation13] sm:$0xff]  ;;  %v578_v14 = vld [vmem:[#allocation13 + $0x8] sm:$0xff]  ;;  %s2310_s29 = smov 80   ;;  %s2857_s28 = sld [smem:[#allocation28_spill]]  ;;  %vm1085_vm5 = vcmask 261248  }
  0xdf   : > { %1862 = vmatpush3.bf16.msra.mxu1 %v1861_v5  ;;  %v1876_v15 = vpack.c.bf16 %v665_v10, %v664_v9  ;;  %v491_v16 = vld [vmem:[%s429_s27] sm:$0xff]  ;;  %v1867_v17 = vpack.c.bf16 %v578_v14, %v577_v13  ;;  %v661_v18 = vld [vmem:[%s420_s7] sm:$0xff]  ;;  %s2311_s25 = smov 16   ;;  %s2312_s23 = smov 32   ;;  %vm1260_vm6 = vcmask 392448   ;;  %vm1435_vm7 = vcmask 523648  }
  0xe0   : > { %1863 = vmatprep.subr.bf16.mxu1 %v2305_v0  ;;  %1874 = vmatpush3.bf16.msra.mxu0 %v1873_v12  ;;  %v579_v19 = vld [vmem:[#allocation13 + $0x10] sm:$0xff]  ;;  %v580_v20 = vld [vmem:[#allocation13 + $0x18] sm:$0xff]  ;;  %v1704_v22 = vld [vmem:[%s2816_s6] ss:$0 sm:$0xff]  ;;  %s2858_s16 = sld [smem:[#allocation23_spill]]  ;;  %s2313_s7 = smov 48  }
  0xe1   : > { %1875 = vmatprep.subr.bf16.mxu0 %v2305_v0  ;;  %v1870_v21 = vpack.c.bf16 %v580_v20, %v579_v19  ;;  %v1708_v28 = vld [vmem:[%s2815_s5] ss:$0 sm:$0xff]  ;;  %s2859_s27 = sld [smem:[#allocation30_spill]]  ;;  %s486_s30 = scalar_lea.vmem [#allocation16], %s2636_s4 }
  0xe2   : > { %s1543_s21 = sshll.u32 %s486_s30, 4  ;;  %s1529_s8 = scalar_lea.sflag [#allocation7], %s2633_s3  ;;  %s2763_s21 = int_to_ptr.vmem [resolvable:$true] %s1543_s21 }
  0xe3   : > { %1865 = vmatpush3.bf16.msra.mxu1 %v1864_v11  ;;  %s2197_s2 = scalar_lea.vmem %s2763_s21, 128  ;;  %p2861_p13 = scmp.ne.s32.totalorder %s2846_s10, 0 }
  0xe4   : > { %1866 = vmatprep.subr.bf16.mxu1 %v2305_v0  ;;  %1877 = vmatpush3.bf16.msra.mxu0 %v1876_v15  ;;  %v1706_v31 = vld [vmem:[%s2857_s28] ss:$0 sm:$0xff]  ;;  %p2198_p6 = scmp.ne.s32.totalorder %s2763_s21, %s2197_s2  ;;  %s2314_s4 = smov [#allocation16]  }
  0xe5   : > { %1811 = vmatprep.subr.mxu0 %v2307_v1  ;;  %s2201_s28 = sshll.u32 %s2314_s4, 4  ;;  %s2202_s28 = int_to_ptr.vmem [resolvable:$false] %s2201_s28 }
  0xe6   : > { %1777 = vmatmul.mubr.msk.f32.vlgmr.msra.gmra.mrb[0].mxu1 %vm503_vm1, %v491_v16  ;;  %s1725_s19 = sshll.u32 %s2858_s16, 7  ;;  %p2199_p4 = pnand %p2198_p6, %p2861_p13 }
  0xe7   : > { %1868 = vmatpush3.bf16.msra.mxu1 %v1867_v17  ;;  %1787 = vmatprep.mubr.msk.f32.mxu1 %vm2306_vm0, %v2307_v1  ;;  %p2204_p0 = scmp.lt.s32.totalorder %s2763_s21, %s2202_s28 }
  0xe8   : > { %1799 = vmatmul.mubr.msk.f32.vlgmr.msra.gmra.mrb[0].mxu0 %vm503_vm1, %v661_v18  ;;  %1869 = vmatprep.subr.bf16.mxu1 %v2305_v0  ;;  %p2200_p9 = pneg %p2199_p4 }
  0xe9   : > { %1813 = vmatprep.mubr.msk.f32.mxu0 %vm2306_vm0, %v2307_v1 }
  0xeb   : > { %1871 = vmatpush3.bf16.msra.mxu1 %v1870_v21 }
  0xec   : > { %1801 = vmatprep.subr.mxu1 %v2307_v1 }
  0xee   : > { %1788 = vmatmul.mubr.msk.f32.vlgmr.msra.gmra.mrb[2].mxu1 %vm503_vm1, %v491_v16 }
  0xef   : > { %1803 = vmatprep.mubr.msk.f32.mxu1 %vm2306_vm0, %v2307_v1 }
 0x1b9   : > { %v573_v23 = vpop.f32.mrb[0].mxu1 }
 0x1ba   : > { %v574_v24 = vadd.f32 %v1704_v22, %v573_v23  ;;  %v1778_v25 = vpop.f32.mrb[1].mxu1 }
 0x1bb   : > { %v743_v26 = vpop.f32.mrb[0].mxu0 }
 0x1bc   : > { %659 = vst.msk [vmem:[#allocation2] sm:$0xff] %vm658_vm2, %v574_v24  ;;  %v1800_v27 = vpop.f32.mrb[1].mxu0  ;;  %v744_v30 = vadd.f32 %v1708_v28, %v743_v26 }
 0x1c1   : > { %v654_v32 = vpop.f32.mrb[2].mxu1 }
 0x1c2   : > { %v655_v33 = vadd.f32 %v1706_v31, %v654_v32  ;;  %v1789_v34 = vpop.f32.mrb[3].mxu1  ;;  %v1440_v32 = vld [vmem:[#allocation14 + $0x10] sm:$0xff] }
 0x1c3   : > { %v1087_v29 = vld [vmem:[#allocation2] sm:$0xff] }
 0x1c4   : > { %1091 = vrot.lane.b32.xlu1 %v1087_v29, %s2308_s24  ;;  %916 = vrot.lane.b32.xlu0 %v1087_v29, %s2309_s26  ;;  %660 = vst.msk [vmem:[#allocation3] sm:$0xff] %vm658_vm2, %v655_v33  ;;  %v1441_v33 = vld [vmem:[#allocation14 + $0x18] sm:$0xff] }
 0x1c5   : > { %1802 = vmatpush3.xpose.msk.msra.mxu1 %vm748_vm3, %v1087_v29  ;;  %v1882_v34 = vpack.c.bf16 %v1441_v33, %v1440_v32 }
 0x1c6   : > { %1806 = vmatprep.subr.mxu1 %v2307_v1 }
 0x1c8   : > { %1804 = vmatmul.mubr.msk.f32.vlgmr.msra.gmra.mrb[4].mxu1 %vm748_vm3, %v744_v30  ;;  %1088 = vrot.lane.b32.xlu1 %v744_v30, %s2308_s24 }
 0x1c9   : > { %913 = vrot.lane.b32.xlu0 %v744_v30, %s2309_s26  ;;  %1808 = vmatprep.mubr.msk.f32.mxu1 %vm2306_vm0, %v2307_v1 }
 0x1cb   : > { %v837_v41 = vld [vmem:[#allocation3] sm:$0xff] }
 0x1cc   : > { %1263 = vrot.lane.b32.xlu1 %v744_v30, %s2310_s29  ;;  %1807 = vmatpush3.msra.mxu1 %v837_v41  ;;  %v1439_v30 = vld [vmem:[#allocation14 + $0x8] sm:$0xff] }
 0x1cd   : > { %1266 = vrot.lane.b32.xlu0 %v1087_v29, %s2310_s29  ;;  %1816 = vmatprep.subr.mxu1 %v2307_v1  ;;  %v1438_v29 = vld [vmem:[#allocation14] sm:$0xff] }
 0x1ce   : > { %v1879_v31 = vpack.c.bf16 %v1439_v30, %v1438_v29 }
 0x236   : > { %v917_v35 = vpop.permute.xlu0 %916  ;;  %v1092_v36 = vpop.permute.xlu1 %1091 }
 0x237   : > { %1812 = vmatpush3.xpose.msk.msra.mxu0 %vm748_vm3, %v917_v35  ;;  %v1443_v35 = vld [vmem:[#allocation14 + $0x28] sm:$0xff] }
 0x238   : > { %1821 = vmatprep.subr.mxu0 %v2307_v1 }
 0x23a   : > { %v1089_v38 = vpop.permute.xlu1 %1088 }
 0x23b   : > { %v914_v37 = vpop.permute.xlu0 %913 }
 0x23c   : > { %1814 = vmatmul.mubr.msk.f32.vlgmr.msra.gmra.mrb[2].mxu0 %vm748_vm3, %v914_v37  ;;  %v1444_v37 = vld [vmem:[#allocation14 + $0x30] sm:$0xff] }
 0x23d   : > { %1822 = vmatpush3.xpose.msk.msra.mxu0 %vm748_vm3, %v1092_v36  ;;  %1823 = vmatprep.mubr.msk.f32.mxu0 %vm2306_vm0, %v2307_v1 }
 0x23e   : > { %1831 = vmatprep.subr.mxu0 %v2307_v1  ;;  %v1264_v40 = vpop.permute.xlu1 %1263 }
 0x23f   : > { %v1267_v39 = vpop.permute.xlu0 %1266 }
 0x240   : > { %1824 = vmatmul.mubr.msk.f32.vlgmr.msra.gmra.mrb[4].mxu0 %vm748_vm3, %v1089_v38  ;;  %v1445_v38 = vld [vmem:[#allocation14 + $0x38] sm:$0xff] }
 0x241   : > { %1832 = vmatpush3.xpose.msk.msra.mxu0 %vm748_vm3, %v1267_v39  ;;  %1833 = vmatprep.mubr.msk.f32.mxu0 %vm2306_vm0, %v2307_v1  ;;  %v1888_v39 = vpack.c.bf16 %v1445_v38, %v1444_v37 }
 0x242   : > { %1878 = vmatprep.subr.bf16.mxu0 %v2305_v0 }
 0x244   : > { %1834 = vmatmul.mubr.msk.f32.vlgmr.msra.gmra.mrb[6].mxu0 %vm748_vm3, %v1264_v40 }
 0x245   : > { %1857 = vmatprep.mubr.msk.f32.mxu0 %vm2306_vm0, %v2307_v1  ;;  %1880 = vmatpush3.bf16.msra.mxu0 %v1879_v31 }
 0x246   : > { %1881 = vmatprep.subr.bf16.mxu0 %v2305_v0 }
 0x249   : > { %1883 = vmatpush3.bf16.msra.mxu0 %v1882_v34 }
 0x24a   : > { %1884 = vmatprep.subr.bf16.mxu0 %v2305_v0 }
 0x29b   : > { %v821_v42 = vpop.f32.mrb[4].mxu1 }
 0x29c   : > { %v1805_v43 = vpop.f32.mrb[5].mxu1  ;;  %v826_v44 = vsel %vm825_vm4, %v821_v42, -inf }
 0x29d   : > { %827 = vmax.xlane.f32.xlu0 %v826_v44 }
 0x30f   : > { %v988_v45 = vpop.f32.mrb[2].mxu0 }
 0x310   : > { %v1815_v46 = vpop.f32.mrb[3].mxu0  ;;  %v992_v47 = vsel %vm825_vm4, %v988_v45, -inf }
 0x311   : > { %993 = vmax.xlane.f32.xlu1 %v992_v47 }
 0x313   : > { %v1163_v48 = vpop.f32.mrb[4].mxu0 }
 0x314   : > { %v1825_v49 = vpop.f32.mrb[5].mxu0  ;;  %v1167_v50 = vsel %vm825_vm4, %v1163_v48, -inf }
 0x315   : > { %1168 = vmax.xlane.f32.xlu0 %v1167_v50  ;;  %v1722_v49 = vld [vmem:[%s2859_s27] ss:$0 sm:$0xff] }
 0x317   : > { %v1338_v51 = vpop.f32.mrb[6].mxu0 }
 0x318   : > { %v1835_v52 = vpop.f32.mrb[7].mxu0  ;;  %v1342_v53 = vsel %vm825_vm4, %v1338_v51, -inf }
 0x319   : > { %1343 = vmax.xlane.f32.xlu0 %v1342_v53 }
 0x322   : > { %1005 = vrot.lane.b32.xlu1 %v837_v41, %s2309_s26  ;;  %s2860_s26 = sld [smem:[#allocation31_spill]] }
 0x32a   : > { %v828_v54 = vpop.xlane.xlu0 %827 }
 0x32b   : > { %v829_v55 = vsub.f32 %v821_v42, %v828_v54 }
 0x32d   : > { %v830_v56 = vmul.f32 1.442695, %v829_v55 }
 0x32f   : > { %2009 = vpow2.f32 %v830_v56 }
 0x339   : > { %v2010_v57 = vpop.eup %2009 }
 0x33a   : > { %v832_v58 = vsel %vm825_vm4, %v2010_v57, 0.0 }
 0x346   : > { %833 = vadd.xlane.f32.xlu1 %v832_v58 }
 0x39e   : > { %v994_v59 = vpop.xlane.xlu1 %993 }
 0x39f   : > { %v995_v60 = vsub.f32 %v988_v45, %v994_v59 }
 0x3a1   : > { %v996_v61 = vmul.f32 1.442695, %v995_v60 }
 0x3a2   : > { %v1169_v62 = vpop.xlane.xlu0 %1168  ;;  %v1006_v12 = vpop.permute.xlu1 %1005 }
 0x3a3   : > { %2011 = vpow2.f32 %v996_v61  ;;  %v1170_v63 = vsub.f32 %v1163_v48, %v1169_v62 }
 0x3a5   : > { %v1171_v2 = vmul.f32 1.442695, %v1170_v63 }
 0x3a6   : > { %v1344_v3 = vpop.xlane.xlu0 %1343 }
 0x3a7   : > { %2013 = vpow2.f32 %v1171_v2  ;;  %v1345_v4 = vsub.f32 %v1338_v51, %v1344_v3 }
 0x3a9   : > { %v1346_v5 = vmul.f32 1.442695, %v1345_v4 }
 0x3ab   : > { %2015 = vpow2.f32 %v1346_v5 }
 0x3ad   : > { %v2012_v6 = vpop.eup %2011 }
 0x3ae   : > { %v998_v7 = vsel %vm825_vm4, %v2012_v6, 0.0 }
 0x3af   : > { %999 = vadd.xlane.f32.xlu0 %v998_v7 }
 0x3b1   : > { %v2014_v8 = vpop.eup %2013 }
 0x3b2   : > { %v1173_v9 = vsel %vm825_vm4, %v2014_v8, 0.0 }
 0x3b3   : > { %1174 = vadd.xlane.f32.xlu1 %v1173_v9 }
 0x3b5   : > { %v2016_v10 = vpop.eup %2015 }
 0x3b6   : > { %v1348_v11 = vsel %vm825_vm4, %v2016_v10, 0.0 }
 0x3b7   : > { %1349 = vadd.xlane.f32.xlu0 %v1348_v11 }
 0x3c4   : > { %1355 = vrot.lane.b32.xlu1 %v837_v41, %s2310_s29  ;;  %s2761_s29 = scalar_lea.hbm %s2860_s26, %s1725_s19 }
 0x3cd   : > { %1180 = vrot.lane.b32.xlu0 %v837_v41, %s2308_s24 }
 0x3d3   : > { %v834_v13 = vpop.xlane.xlu1 %833 }
 0x3d4   : > { %2017 = vrcp.f32 %v834_v13 }
 0x3de   : > { %v2018_v14 = vpop.eup %2017 }
 0x3df   : > { %v836_v15 = vmul.f32 %v2018_v14, %v2010_v57 }
 0x3e1   : > { %1809 = vmatmul.mubr.msk.f32.vlgmr.msra.gmra.mrb[6].mxu1 %vm825_vm4, %v836_v15 }
 0x3e2   : > { %1817 = vmatpush3.msra.mxu1 %v1006_v12  ;;  %1818 = vmatprep.mubr.msk.f32.mxu1 %vm2306_vm0, %v2307_v1 }
 0x3e3   : > { %1826 = vmatprep.subr.mxu1 %v2307_v1 }
 0x43c   : > { %v1000_v16 = vpop.xlane.xlu0 %999 }
 0x43d   : > { %2019 = vrcp.f32 %v1000_v16 }
 0x440   : > { %v1175_v17 = vpop.xlane.xlu1 %1174 }
 0x441   : > { %2021 = vrcp.f32 %v1175_v17 }
 0x444   : > { %v1350_v18 = vpop.xlane.xlu0 %1349  ;;  %v1356_v24 = vpop.permute.xlu1 %1355 }
 0x445   : > { %2023 = vrcp.f32 %v1350_v18 }
 0x447   : > { %v2020_v19 = vpop.eup %2019 }
 0x448   : > { %v1002_v20 = vmul.f32 %v2020_v19, %v2012_v6  ;;  %v1181_v21 = vpop.permute.xlu0 %1180 }
 0x44a   : > { %1819 = vmatmul.mubr.msk.f32.vlgmr.msra.gmra.mrb[8].mxu1 %vm825_vm4, %v1002_v20 }
 0x44b   : > { %v2022_v22 = vpop.eup %2021  ;;  %1827 = vmatpush3.msra.mxu1 %v1181_v21  ;;  %1828 = vmatprep.mubr.msk.f32.mxu1 %vm2306_vm0, %v2307_v1 }
 0x44c   : > { %v1177_v23 = vmul.f32 %v2022_v22, %v2014_v8  ;;  %1836 = vmatprep.subr.mxu1 %v2307_v1 }
 0x44e   : > { %1829 = vmatmul.mubr.msk.f32.vlgmr.msra.gmra.mrb[10].mxu1 %vm825_vm4, %v1177_v23 }
 0x44f   : > { %v2024_v25 = vpop.eup %2023  ;;  %1837 = vmatpush3.msra.mxu1 %v1356_v24  ;;  %1838 = vmatprep.mubr.msk.f32.mxu1 %vm2306_vm0, %v2307_v1  ;;  %v1442_v1 = vld [vmem:[#allocation14 + $0x20] sm:$0xff] }
 0x450   : > { %v1352_v26 = vmul.f32 %v2024_v25, %v2016_v10  ;;  %v1885_v36 = vpack.c.bf16 %v1443_v35, %v1442_v1 }
 0x452   : > { %1839 = vmatmul.mubr.msk.f32.vlgmr.msra.gmra.mrb[12].mxu1 %vm825_vm4, %v1352_v26  ;;  %1886 = vmatpush3.bf16.msra.mxu0 %v1885_v36 }
 0x453   : > { %1887 = vmatprep.subr.bf16.mxu0 %v2305_v0 }
 0x456   : > { %1889 = vmatpush3.bf16.msra.mxu0 %v1888_v39 }
 0x4b4   : > { %v907_v27 = vpop.f32.mrb[6].mxu1 }
 0x4b5   : > { %911 = vst.msk [vmem:[#allocation4] sm:$0xff] %vm748_vm3, %v907_v27  ;;  %v1810_v28 = vpop.f32.mrb[7].mxu1 }
 0x51d   : > { %v1077_v40 = vpop.f32.mrb[8].mxu1 }
 0x51e   : > { %1082 = vrot.lane.b32.xlu1 %v1077_v40, %s2311_s25  ;;  %v1820_v41 = vpop.f32.mrb[9].mxu1  ;;  %s2203_s25 = scalar_lea.vmem %s2202_s28, 256 }
 0x51f   : > { %p2205_p7 = scmp.lt.s32.totalorder %s2203_s25, %s2197_s2 }
 0x521   : > { %v1252_v42 = vpop.f32.mrb[10].mxu1  ;;  %p2206_p11 = por %p2205_p7, %p2204_p0 }
 0x522   : > { %1257 = vrot.lane.b32.xlu0 %v1252_v42, %s2312_s23  ;;  %v1830_v43 = vpop.f32.mrb[11].mxu1 }
 0x523   : > { %p2207_p2 = pnand %p2206_p11, %p2200_p9 }
 0x525   : > { %v1427_v44 = vpop.f32.mrb[12].mxu1 }
 0x526   : > { %1432 = vrot.lane.b32.xlu1 %v1427_v44, %s2313_s7  ;;  %v1840_v45 = vpop.f32.mrb[13].mxu1 }
 0x590   : > { %v1083_v46 = vpop.permute.xlu1 %1082 }
 0x591   : > { %1086 = vst.msk [vmem:[#allocation4] sm:$0xff] %vm1085_vm5, %v1083_v46 }
 0x594   : > { %v1258_v0 = vpop.permute.xlu0 %1257 }
 0x595   : > { %1261 = vst.msk [vmem:[#allocation4] sm:$0xff] %vm1260_vm6, %v1258_v0 }
 0x598   : > { %v1433_v47 = vpop.permute.xlu1 %1432 }
 0x599   : > { %1436 = vst.msk [vmem:[#allocation4] sm:$0xff] %vm1435_vm7, %v1433_v47 }
 0x5a0   : > { %v1437_v48 = vld [vmem:[#allocation4] sm:$0xff] }
 0x5a1   : > { %1858 = vmatmul.mubr.msk.f32.vlgmr.msra.gmra.mrb[8].mxu0 %vm658_vm2, %v1437_v48 }
 0x674   : > { %v1523_v50 = vpop.f32.mrb[8].mxu0 }
 0x675   : > { %v1524_v51 = vadd.f32 %v1722_v49, %v1523_v50  ;;  %v1859_v52 = vpop.f32.mrb[9].mxu0 }
 0x677   : > { %1527 = vst [vmem:[%s486_s30] sm:$0xff] %v1524_v51 }
 0x678   : > { %2210 = shalt.err (!%p2207_p2)
}
 0x679   : > { %s2211_s3 = scalar_lea.hbm %s2761_s29, 128  ;;  %s2215_s7 = scalar_lea.hbm %s2860_s26, 256 }
 0x67a   : > { %p2212_p10 = scmp.ne.s32.totalorder %s2761_s29, %s2211_s3  ;;  %p2216_p8 = scmp.lt.u32.totalorder %s2761_s29, %s2860_s26 }
 0x67b   : > { %p2217_p3 = scmp.lt.u32.totalorder %s2215_s7, %s2211_s3  ;;  %p2219_p6 = scmp.lt.u32.totalorder %s2211_s3, %s2761_s29 }
 0x67c   : > { %p2213_p1 = pnand %p2212_p10, %p2861_p13 }
 0x67d   : > { %p2218_p12 = por %p2217_p3, %p2216_p8 }
 0x67e   : > { %p2214_p5 = pneg %p2213_p1 }
 0x67f   : > { %p2220_p4 = por %p2219_p6, %p2218_p12 }
 0x681   : > { %p2221_p9 = pnand %p2220_p4, %p2214_p5 }
 0x683   : > { %2224 = shalt.err (!%p2221_p9)
}
 0x684   : > { %1910 = dma.vmem_to_hbm [thread:$0]  (%p2861_p13), %s2763_s21, 128, %s2761_s29, %s1529_s8  }
 0x685 PF: > { %s1555_s27 = sand.u32 1, %s2275_s13   ;;  %p2862_p0 = scmp.ne.s32.totalorder %s2847_s12, 0 }
 0x686   : > { %p2863_p7 = scmp.ge.s32.totalorder %s2295_s18, 2  ;;  %s1556_s19 = scalar_lea.sflag [#allocation7], %s1555_s27 }
 0x688   : > { %p1933_p11 = pnand %p2863_p7, %p2862_p0 }
 0x68a   : > { %2270 = dma.done.wait (!%p1933_p11), %s1556_s19, 128  }
 0x68b   : > { %2272 = vsyncadd (!%p1933_p11), %s1556_s19, 4294967168  ;;  %s31_s18 = sadd.s32 1, %s2295_s18   ;;  %s2864_s10 = sld [smem:[#allocation24_spill]] }
 0x68c   : > { %p28_p2 = scmp.ge.s32.totalorder %s31_s18, 4   ;;  %s2865_s13 = smov %s2279_s14 }
 0x68d   : > { %s2866_s14 = smov %s2283_s15  ;;  %s2867_s15 = smov %s2554_s11 }
 0x68e   : > { %s2868_s16 = smov %s2291_s17  ;;  %30 = sbr.rel (!%p28_p2) target bundleno = 18 (0x12), region = 138 }
 0x691   : > { %s2869_s17 = smov %s2864_s10 }
 0x695   :  { %1561 = vsyncpa [#allocation6], 1 }
 0x696   :  { %1563 = vsyncpa [#allocation6 + $0x1], 1 }
 0x697   :  { %1564 = vsyncpa [#allocation9], 1 }
 0x698   :  { %1566 = vsyncpa [#allocation9 + $0x1], 1 }
 0x699   :  { %1567 = vsyncpa [#allocation12], 1 }
 0x69a   :  { %1568 = vsyncpa [#allocation15], 1 }
 0x69b   :  { %1569 = vsyncpa [#allocation7], 1 }
 0x69c   :  { %1571 = vsyncpa [#allocation7 + $0x1], 1 }

</bundles_post_ra>
